<compile_context>
chip_gen: v7x
topology: tpu7x:2x2x1
jax: 0.10.0
libtpu: 0.0.40
codegen_flags: <defaults>
</compile_context>

<pallas_src>
import jax
import jax.numpy as jnp
from jax.experimental import pallas as pl
from jax.experimental.pallas import tpu as pltpu


_LANE_CANDIDATES = (2048, 1024, 512, 256, 128)


def _drop_path_kernel(scale_ref, skip_ref, res_ref, out_ref):
    # scale_ref: (TM, 1) f32 per-row scale (mask / keep_prob), broadcast over lanes.
    # skip_ref / res_ref / out_ref: (TM, LANE) tiles.
    s = scale_ref[...]
    out_ref[...] = (skip_ref[...] + res_ref[...] * s).astype(out_ref.dtype)


def _round_up(x, m):
    return -(-x // m) * m


def _generation_params():
    """Returns (VMEM budget for pipeline buffers, scoped-VMEM limit) in bytes."""
    kind = ""
    try:
        kind = jax.devices()[0].device_kind.lower()
    except Exception:
        pass
    if ("v5" in kind) or ("v6" in kind):
        # 128 MiB physical VMEM generations: big tiles, raised scoped limit.
        return 48 << 20, 64 << 20
    # v7x (64 MiB physical VMEM per TC) or unknown backend: stay conservative.
    return 28 << 20, 40 << 20


def drop_path(skip, residual, drop_prob, *, key=None, training=True):
    """Pallas DropPath forward. skip/residual: (B, ...) arrays, same shape/dtype.

    drop_prob / training must be static Python values (they select the code path).
    """
    assert skip.shape == residual.shape and skip.dtype == residual.dtype
    assert 0.0 <= drop_prob < 1.0, "drop_prob must be in [0, 1)"

    if (not training) or drop_prob == 0.0:
        # Inference hot path: no mask machinery; XLA fuses the add.
        return skip + residual

    orig_shape = skip.shape
    B = orig_shape[0]
    n = 1
    for d in orig_shape[1:]:
        n *= d
    assert n > 0

    keep_prob = 1.0 - drop_prob
    assert key is not None, "PRNG key required when training with drop_prob > 0"
    mask = jax.random.bernoulli(key, keep_prob, (B,))
    # Fold 1/keep_prob into the per-sample scale on the host (f32).
    scale = mask.astype(jnp.float32) * jnp.float32(1.0 / keep_prob)  # (B,)

    # ---- lane-dense layout: (B, n) -> (total_rows, lane) -------------------
    n_pad = _round_up(n, 128)
    lane = next(c for c in _LANE_CANDIDATES if n_pad % c == 0)
    rows = n_pad // lane                     # rows per sample
    total_rows = B * rows

    skip2 = skip.reshape(B, n)
    res2 = residual.reshape(B, n)
    if n_pad != n:
        # Ragged feature length: pad to a multiple of 128 so stores stay
        # unmasked/lane-dense; padded tail is sliced off after the kernel.
        pad = ((0, 0), (0, n_pad - n))
        skip2 = jnp.pad(skip2, pad)
        res2 = jnp.pad(res2, pad)
    skip2 = skip2.reshape(total_rows, lane)
    res2 = res2.reshape(total_rows, lane)

    # Per-row scale column (constant within a sample's rows).
    scale_rows = jnp.broadcast_to(scale[:, None], (B, rows)).reshape(total_rows, 1)

    # ---- generation-aware row tiling ---------------------------------------
    itemsize = skip.dtype.itemsize
    mult = max(8, 32 // itemsize)            # sublane packing: 8/16/32 rows
    buf_budget, vmem_limit = _generation_params()
    # Double-buffered VMEM per row: skip + res + out rows, plus the (row, 1)
    # f32 scale row padded to 128 lanes in VMEM.
    per_row_bytes = 3 * lane * itemsize + 128 * 4
    tm_cap = max(mult, (buf_budget // (2 * per_row_bytes)) // mult * mult)

    if total_rows >= 2 * mult:
        # Keep >= 2 grid steps (v7x dual-TC + DMA pipelining), balanced sizes.
        steps = max(2, -(-total_rows // tm_cap))
        tm = _round_up(-(-total_rows // steps), mult)
    else:
        tm = total_rows                       # single tiny block (full extent)
    grid = (pl.cdiv(total_rows, tm),)

    data_spec = pl.BlockSpec((tm, lane), lambda i: (i, 0))
    scale_spec = pl.BlockSpec((tm, 1), lambda i: (i, 0))

    out2 = pl.pallas_call(
        _drop_path_kernel,
        out_shape=jax.ShapeDtypeStruct((total_rows, lane), skip.dtype),
        grid=grid,
        in_specs=[scale_spec, data_spec, data_spec],
        out_specs=data_spec,
        compiler_params=pltpu.CompilerParams(
            dimension_semantics=("parallel",),
            vmem_limit_bytes=vmem_limit,
        ),
    )(scale_rows, skip2, res2)

    out = out2.reshape(B, n_pad)
    if n_pad != n:
        out = out[:, :n]
    return out.reshape(orig_shape)


def _reference(skip, residual, drop_prob, key):
    keep_prob = 1.0 - drop_prob
    B = skip.shape[0]
    mask = jax.random.bernoulli(key, keep_prob, (B,)).astype(jnp.float32)
    bshape = (B,) + (1,) * (skip.ndim - 1)
    res_f = residual.astype(jnp.float32) * mask.reshape(bshape) / keep_prob
    return (skip.astype(jnp.float32) + res_f).astype(skip.dtype)


if __name__ == "__main__":
    key = jax.random.PRNGKey(0)
    k_skip, k_res, k_mask, k2, k3 = jax.random.split(key, 5)
    drop_prob = 0.25

    # --- main case: (B, C, H, W) = (2, 4, 16, 16), f32, training -------------
    B, C, H, W = 2, 4, 16, 16
    skip = jax.random.normal(k_skip, (B, C, H, W), dtype=jnp.float32)
    residual = jax.random.normal(k_res, (B, C, H, W), dtype=jnp.float32)

    out_train = drop_path(skip, residual, drop_prob, key=k_mask, training=True)
    out_train = jax.block_until_ready(out_train)
    ref_train = _reference(skip, residual, drop_prob, k_mask)
    assert out_train.shape == skip.shape and out_train.dtype == skip.dtype
    assert jnp.allclose(out_train, ref_train, atol=1e-5, rtol=1e-5)

    # --- eval / drop_prob == 0 path: plain fused add (kernel bypassed) -------
    out_eval = drop_path(skip, residual, drop_prob, training=False)
    out_eval = jax.block_until_ready(out_eval)
    assert jnp.allclose(out_eval, skip + residual, atol=1e-6, rtol=1e-6)

    # --- ragged feature length (pads 147 -> 256, slices back) ----------------
    skip_r = jax.random.normal(k2, (2, 3, 7, 7), dtype=jnp.float32)
    res_r = jax.random.normal(k3, (2, 3, 7, 7), dtype=jnp.float32)
    out_r = jax.block_until_ready(
        drop_path(skip_r, res_r, drop_prob, key=k_mask, training=True))
    assert jnp.allclose(out_r, _reference(skip_r, res_r, drop_prob, k_mask),
                        atol=1e-5, rtol=1e-5)

    # --- partial last grid block (total_rows=26, tm=16) ----------------------
    skip_p = jax.random.normal(k2, (2, 13, 128), dtype=jnp.float32)
    res_p = jax.random.normal(k3, (2, 13, 128), dtype=jnp.float32)
    out_p = jax.block_until_ready(
        drop_path(skip_p, res_p, drop_prob, key=k_mask, training=True))
    assert jnp.allclose(out_p, _reference(skip_p, res_p, drop_prob, k_mask),
                        atol=1e-5, rtol=1e-5)

    # --- bf16 inputs ----------------------------------------------------------
    skip_b = jax.random.normal(k2, (4, 8, 32), dtype=jnp.bfloat16)
    res_b = jax.random.normal(k3, (4, 8, 32), dtype=jnp.bfloat16)
    out_b = jax.block_until_ready(
        drop_path(skip_b, res_b, drop_prob, key=k_mask, training=True))
    assert out_b.dtype == jnp.bfloat16
    assert jnp.allclose(out_b.astype(jnp.float32),
                        _reference(skip_b, res_b, drop_prob, k_mask).astype(jnp.float32),
                        atol=1e-2, rtol=1e-2)

    print("KERNEL_OK")
</pallas_src>

<mosaic_0001>
module attributes {stable_mosaic.version = 11 : i64} {
  func.func @_drop_path_kernel(%arg0: i32, %arg1: memref<2x1xf32, #tpu.memory_space<vmem>>, %arg2: memref<2x1024xf32, #tpu.memory_space<vmem>>, %arg3: memref<2x1024xf32, #tpu.memory_space<vmem>>, %arg4: memref<2x1024xf32, #tpu.memory_space<vmem>>) attributes {dimension_semantics = [#tpu.dimension_semantics<parallel>], iteration_bounds = array<i64: 1>, scalar_prefetch = 0 : i64, scratch_operands = 0 : i64, tpu.core_type = #tpu.core_type<tc>, window_params = [{transform_indices = @transform_0, window_bounds = array<i64: 2, 1>}, {transform_indices = @transform_1, window_bounds = array<i64: 2, 1024>}, {transform_indices = @transform_2, window_bounds = array<i64: 2, 1024>}, {transform_indices = @transform_3, window_bounds = array<i64: 2, 1024>}]} {
    %c0 = arith.constant 0 : index
    %c0_0 = arith.constant 0 : index
    %0 = vector.load %arg1[%c0, %c0_0] : memref<2x1xf32, #tpu.memory_space<vmem>>, vector<2x1xf32>
    %c0_1 = arith.constant 0 : index
    %c0_2 = arith.constant 0 : index
    %1 = vector.load %arg2[%c0_1, %c0_2] : memref<2x1024xf32, #tpu.memory_space<vmem>>, vector<2x1024xf32>
    %c0_3 = arith.constant 0 : index
    %c0_4 = arith.constant 0 : index
    %2 = vector.load %arg3[%c0_3, %c0_4] : memref<2x1024xf32, #tpu.memory_space<vmem>>, vector<2x1024xf32>
    %3 = vector.broadcast %0 : vector<2x1xf32> to vector<2x1024xf32>
    %4 = arith.mulf %2, %3 : vector<2x1024xf32>
    %5 = arith.addf %1, %4 : vector<2x1024xf32>
    %c0_5 = arith.constant 0 : index
    %c0_6 = arith.constant 0 : index
    %6 = vector.load %arg4[%c0_5, %c0_6] : memref<2x1024xf32, #tpu.memory_space<vmem>>, vector<2x1024xf32>
    tpu.vector_store %arg4[%c0_5, %c0_6], %5 {strides = array<i32>} : memref<2x1024xf32, #tpu.memory_space<vmem>>, vector<2x1024xf32>,
    return
  }
  func.func @transform_0(%arg0: i32) -> (i32, i32) {
    %c0_i32 = arith.constant 0 : i32
    %c0_i32_0 = arith.constant 0 : i32
    return %arg0, %c0_i32 : i32, i32
  }
  func.func @transform_1(%arg0: i32) -> (i32, i32) {
    %c0_i32 = arith.constant 0 : i32
    %c0_i32_0 = arith.constant 0 : i32
    return %arg0, %c0_i32 : i32, i32
  }
  func.func @transform_2(%arg0: i32) -> (i32, i32) {
    %c0_i32 = arith.constant 0 : i32
    %c0_i32_0 = arith.constant 0 : i32
    return %arg0, %c0_i32 : i32, i32
  }
  func.func @transform_3(%arg0: i32) -> (i32, i32) {
    %c0_i32 = arith.constant 0 : i32
    %c0_i32_0 = arith.constant 0 : i32
    return %arg0, %c0_i32 : i32, i32
  }
}

</mosaic_0001>

<bundles_post_ra>
// kernel: tpu_custom_call.1
= control target key start
LH: loop header
LB: loop body
LE: loop exit
PB: predicated region body
PF: predicated region fallthrough
CT: control target
= control target key end

     0   :  { %8 = vsyncpa [#allocation3], 0  ;;  %s220_s0 = inlined_call_operand.vmem [shape: f32[2,1], index: 0, kind: input, shape index: {}]   ;;  %s221_s1 = inlined_call_operand.hbm [shape: f32[2,1024], index: 1, kind: input, shape index: {}]   ;;  %s222_s2 = inlined_call_operand.hbm [shape: f32[2,1024], index: 2, kind: input, shape index: {}]   ;;  %s223_s3 = inlined_call_operand.hbm [shape: f32[2,1024], index: 3, kind: output, shape index: {}]  }
   0x1   :  { %9 = vsyncpa [#allocation6], 0 }
   0x2   :  { %10 = vsyncpa [#allocation4], 0  ;;  %s156_s12 = smov [#allocation2]   ;;  %s157_s14 = smov [#allocation5]  }
   0x3   :  { %s19_s13 = sshll.u32 %s156_s12, 4  ;;  %s29_s15 = sshll.u32 %s157_s14, 4  ;;  %s20_s13 = int_to_ptr.vmem [resolvable:$true] %s19_s13  ;;  %s30_s15 = int_to_ptr.vmem [resolvable:$true] %s29_s15 }
   0x4   :  { %s84_s18 = scalar_lea.hbm %s221_s1, 256 }
   0x5   :  { %p85_p0 = scmp.ne.s32.totalorder %s221_s1, %s84_s18  ;;  %p88_p1 = scmp.lt.u32.totalorder %s84_s18, %s221_s1 }
   0x7   :  { %p90_p2 = pnand %p88_p1, %p85_p0 }
   0x9   :  { %93 = shalt.err (!%p90_p2)
}
   0xa   :  { %s94_s23 = scalar_lea.vmem %s20_s13, 256  ;;  %p99_p4 = scmp.lt.s32.totalorder %s20_s13, %s20_s13 }
   0xb   :  { %p95_p3 = scmp.ne.s32.totalorder %s20_s13, %s94_s23  ;;  %p100_p5 = scmp.lt.s32.totalorder %s94_s23, %s94_s23 }
   0xd   :  { %p101_p6 = por %p100_p5, %p99_p4 }
   0xf   :  { %p102_p7 = pnand %p101_p6, %p95_p3 }
  0x11   :  { %105 = shalt.err (!%p102_p7)
}
  0x12   :  { %22 = dma.hbm_to_vmem [thread:$0]  %s221_s1, 256, %s20_s13, [#allocation3]  }
  0x13   :  { %s106_s28 = scalar_lea.hbm %s222_s2, 256 }
  0x14   :  { %p107_p8 = scmp.ne.s32.totalorder %s222_s2, %s106_s28  ;;  %p110_p9 = scmp.lt.u32.totalorder %s106_s28, %s222_s2 }
  0x16   :  { %p112_p10 = pnand %p110_p9, %p107_p8 }
  0x18   :  { %115 = shalt.err (!%p112_p10)
}
  0x19   :  { %s116_s6 = scalar_lea.vmem %s30_s15, 256  ;;  %p121_p12 = scmp.lt.s32.totalorder %s30_s15, %s30_s15 }
  0x1a   :  { %p117_p11 = scmp.ne.s32.totalorder %s30_s15, %s116_s6  ;;  %p122_p13 = scmp.lt.s32.totalorder %s116_s6, %s116_s6 }
  0x1c   :  { %p123_p0 = por %p122_p13, %p121_p12 }
  0x1e   :  { %p124_p1 = pnand %p123_p0, %p117_p11 }
  0x20   :  { %127 = shalt.err (!%p124_p1)
}
  0x21   :  { %32 = dma.hbm_to_vmem [thread:$0]  %s222_s2, 256, %s30_s15, [#allocation6]  }
  0x22   :  { %150 = dma.done.wait [#allocation3], 256  }
  0x23   :  { %151 = vsyncadd [#allocation3], 4294967040 }
  0x24   :  { %152 = dma.done.wait [#allocation6], 256  }
  0x25   :  { %153 = vsyncadd [#allocation6], 4294967040  ;;  %v158_v0 = vmov 0   ;;  %v39_v1 = vld [vmem:[%s220_s0] sm:$0x3]  ;;  %v51_v4 = vlaneseq  ;;  %v42_v8 = vld [vmem:[#allocation5] sm:$0xff] }
  0x26   :  { %83 = vset.pattern.permute.xlu0 %v158_v0  ;;  %v159_v2 = vmov 269488144   ;;  %v43_v9 = vld [vmem:[#allocation5 + $0x8] sm:$0xff]  ;;  %v40_v12 = vld [vmem:[#allocation2] sm:$0xff]  ;;  %v41_v13 = vld [vmem:[#allocation2 + $0x8] sm:$0xff]  ;;  %s160_s2 = smov [#allocation7]  }
  0x27   :  { %46 = vperm.xlu0 %83, %v39_v1   ;;  %v49_v3 = vunpack.c.l.s4 %v159_v2  ;;  %v52_v6 = vshrl.u32 %v51_v4, 7  ;;  %s68_s10 = sshll.u32 %s160_s2, 4  ;;  %s69_s10 = int_to_ptr.vmem [resolvable:$true] %s68_s10 }
  0x28   :  { %s128_s0 = scalar_lea.vmem %s69_s10, 256  ;;  %p133_p3 = scmp.lt.s32.totalorder %s69_s10, %s69_s10 }
  0x29   :  { %v50_v5 = vunpack.c.0.s8 %v49_v3  ;;  %p129_p2 = scmp.ne.s32.totalorder %s69_s10, %s128_s0  ;;  %p134_p4 = scmp.lt.s32.totalorder %s128_s0, %s128_s0 }
  0x2b   :  { %v53_v7 = vsub.s32 %v50_v5, %v52_v6  ;;  %p135_p5 = por %p134_p4, %p133_p3 }
  0x2d   :  { %p136_p6 = pnand %p135_p5, %p129_p2 }
  0xa6   :  { %v47_v10 = vpop.permute.xlu0 %46 }
  0xa7   :  { %v54_v11 = vrot.slane %v47_v10, %v53_v7 }
  0xa9   :  { %v56_v14 = vmul.f32 %v54_v11, %v42_v8  ;;  %v57_v15 = vmul.f32 %v54_v11, %v43_v9 }
  0xab   :  { %v58_v16 = vadd.f32 %v56_v14, %v40_v12  ;;  %v59_v17 = vadd.f32 %v57_v15, %v41_v13 }
  0xad   :  { %60 = vst [vmem:[#allocation7] sm:$0xff] %v58_v16  ;;  %61 = vst [vmem:[#allocation7 + $0x8] sm:$0xff] %v59_v17 }
  0xae   :  { %139 = shalt.err (!%p136_p6)
}
  0xaf   :  { %s140_s13 = scalar_lea.hbm %s223_s3, 256 }
  0xb0   :  { %p141_p7 = scmp.ne.s32.totalorder %s223_s3, %s140_s13  ;;  %p144_p8 = scmp.lt.u32.totalorder %s140_s13, %s223_s3 }
  0xb2   :  { %p146_p9 = pnand %p144_p8, %p141_p7 }
  0xb4   :  { %149 = shalt.err (!%p146_p9)
}
  0xb5   :  { %71 = dma.vmem_to_hbm [thread:$0]  %s69_s10, 256, %s223_s3, [#allocation4]  }
  0xb6   :  { %154 = dma.done.wait [#allocation4], 256  }
  0xb7   :  { %155 = vsyncadd [#allocation4], 4294967040 }
  0xb8   :  { %75 = vsyncpa [#allocation3], 1 }
  0xb9   :  { %76 = vsyncpa [#allocation6], 1 }
  0xba   :  { %77 = vsyncpa [#allocation4], 1 }

</bundles_post_ra>
